<compile_context>
chip_gen: v7x
topology: tpu7x:2x2x1
jax: 0.10.0
libtpu: 0.0.40
codegen_flags: <defaults>
</compile_context>

<pallas_src>
import math
import functools

import jax
import jax.numpy as jnp
from jax.experimental import pallas as pl
from jax.experimental.pallas import tpu as pltpu

NEG_BIG = -1e30                  # finite causal-mask fill (avoids inf-inf NaN)
EPS = 1e-5
VMEM_LIMIT = 48 * 1024 * 1024    # headroom under v7x's 64 MiB VMEM per core


def _pick_tile(dim, target, quantum):
    """Largest divisor of `dim` that is <= target and a multiple of `quantum`;
    falls back to the full dim (a full-extent block is always legal)."""
    if dim <= target:
        return dim
    t = (target // quantum) * quantum
    while t >= quantum:
        if dim % t == 0:
            return t
        t -= quantum
    return dim


# --------------------- fused RMSNorm + projection kernel ---------------------
def norm_matmul_kernel(x_ref, nw_ref, w_ref, o_ref):
    x = x_ref[...].astype(jnp.float32)                       # (TM, E) f32
    ms = jnp.mean(x * x, axis=-1, keepdims=True)
    xn = x * jax.lax.rsqrt(ms + EPS) * nw_ref[...].astype(jnp.float32)
    o_ref[...] = jnp.dot(xn.astype(jnp.bfloat16), w_ref[...],
                         preferred_element_type=jnp.float32).astype(o_ref.dtype)


def norm_matmul(x2d, norm_w, w_t, out_dtype=jnp.bfloat16):
    M, E = x2d.shape
    N = w_t.shape[1]
    TM = _pick_tile(M, 256, 8)
    TN = _pick_tile(N, 512, 128)
    cost = pl.CostEstimate(
        flops=int(2 * M * E * N + 6 * M * E),
        transcendentals=int(M),
        bytes_accessed=int(M * E * 4 + E * N * 2 + M * N * 2))
    return pl.pallas_call(
        norm_matmul_kernel,
        out_shape=jax.ShapeDtypeStruct((M, N), out_dtype),
        grid=(M // TM, N // TN),
        in_specs=[
            pl.BlockSpec((TM, E), lambda i, j: (i, 0)),
            pl.BlockSpec((1, E), lambda i, j: (0, 0)),
            pl.BlockSpec((E, TN), lambda i, j: (0, j)),
        ],
        out_specs=pl.BlockSpec((TM, TN), lambda i, j: (i, j)),
        compiler_params=pltpu.CompilerParams(
            dimension_semantics=("parallel", "parallel"),
            vmem_limit_bytes=VMEM_LIMIT),
        cost_estimate=cost,
    )(x2d, norm_w, w_t)


# -------------------------- flash attention kernel ---------------------------
def flash_attn_kernel(q_ref, k_ref, v_ref, o_ref, m_sc, l_sc, acc_sc,
                      *, tq, tk, scale):
    qi = pl.program_id(2)
    ki = pl.program_id(3)
    nk = pl.num_programs(3)

    @pl.when(ki == 0)
    def _init():
        m_sc[...] = jnp.full_like(m_sc, NEG_BIG)
        l_sc[...] = jnp.zeros_like(l_sc)
        acc_sc[...] = jnp.zeros_like(acc_sc)

    q_start = qi * tq
    k_start = ki * tk

    # Skip KV blocks that lie entirely above the causal diagonal.
    @pl.when(k_start <= q_start + (tq - 1))
    def _step():
        q = q_ref[0, 0]                                       # (tq, D) bf16
        k = k_ref[0, 0]                                       # (tk, D) bf16
        v = v_ref[0, 0]                                       # (tk, D) bf16
        # q @ k^T via dot_general (contract last dims; no transposed copy).
        s = jax.lax.dot_general(
            q, k, dimension_numbers=(((1,), (1,)), ((), ())),
            preferred_element_type=jnp.float32) * scale       # (tq, tk) f32
        row = q_start + jax.lax.broadcasted_iota(jnp.int32, s.shape, 0)
        col = k_start + jax.lax.broadcasted_iota(jnp.int32, s.shape, 1)
        s = jnp.where(col <= row, s, NEG_BIG)

        m_prev = m_sc[...]
        m_new = jnp.maximum(m_prev, jnp.max(s, axis=-1, keepdims=True))
        alpha = jnp.exp(m_prev - m_new)
        p = jnp.exp(s - m_new)
        l_sc[...] = alpha * l_sc[...] + jnp.sum(p, axis=-1, keepdims=True)
        acc_sc[...] = alpha * acc_sc[...] + jnp.dot(
            p.astype(v.dtype), v, preferred_element_type=jnp.float32)
        m_sc[...] = m_new

    @pl.when(ki == nk - 1)
    def _finalize():
        inv_l = pl.reciprocal(l_sc[...], approx=True)          # EUP, not VPU
        o_ref[0, 0] = (acc_sc[...] * inv_l).astype(o_ref.dtype)


def flash_attention(q, k, v):
    B, H, S, D = q.shape
    TQ = _pick_tile(S, 256, 8)
    TK = _pick_tile(S, 256, 8)
    scale = 1.0 / math.sqrt(D)
    kernel = functools.partial(flash_attn_kernel, tq=TQ, tk=TK, scale=scale)
    cost = pl.CostEstimate(
        flops=int(4 * B * H * S * S * D),
        transcendentals=int(B * H * S * S),
        bytes_accessed=int(4 * B * H * S * D * 2))
    return pl.pallas_call(
        kernel,
        out_shape=jax.ShapeDtypeStruct((B, H, S, D), q.dtype),
        grid=(B, H, S // TQ, S // TK),
        in_specs=[
            pl.BlockSpec((1, 1, TQ, D), lambda b, h, i, j: (b, h, i, 0)),
            pl.BlockSpec((1, 1, TK, D), lambda b, h, i, j: (b, h, j, 0)),
            pl.BlockSpec((1, 1, TK, D), lambda b, h, i, j: (b, h, j, 0)),
        ],
        out_specs=pl.BlockSpec((1, 1, TQ, D), lambda b, h, i, j: (b, h, i, 0)),
        scratch_shapes=[
            pltpu.VMEM((TQ, 1), jnp.float32),   # running max
            pltpu.VMEM((TQ, 1), jnp.float32),   # running denom
            pltpu.VMEM((TQ, D), jnp.float32),   # output accumulator
        ],
        compiler_params=pltpu.CompilerParams(
            dimension_semantics=("parallel", "parallel", "parallel", "arbitrary"),
            vmem_limit_bytes=VMEM_LIMIT),
        cost_estimate=cost,
    )(q, k, v)


# ------------------- output projection + residual kernel ---------------------
def matmul_residual_kernel(a_ref, w_ref, res_ref, o_ref):
    y = jnp.dot(a_ref[...], w_ref[...], preferred_element_type=jnp.float32)
    o_ref[...] = (res_ref[...].astype(jnp.float32) + y).astype(o_ref.dtype)


def matmul_residual(a, w_t, residual):
    M, K = a.shape
    N = w_t.shape[1]
    TM = _pick_tile(M, 256, 8)
    TN = _pick_tile(N, 512, 128)
    cost = pl.CostEstimate(
        flops=int(2 * M * K * N + M * N),
        transcendentals=0,
        bytes_accessed=int(M * K * 2 + K * N * 2 + 2 * M * N * 4))
    return pl.pallas_call(
        matmul_residual_kernel,
        out_shape=jax.ShapeDtypeStruct((M, N), residual.dtype),
        grid=(M // TM, N // TN),
        in_specs=[
            pl.BlockSpec((TM, K), lambda i, j: (i, 0)),
            pl.BlockSpec((K, TN), lambda i, j: (0, j)),
            pl.BlockSpec((TM, TN), lambda i, j: (i, j)),
        ],
        out_specs=pl.BlockSpec((TM, TN), lambda i, j: (i, j)),
        compiler_params=pltpu.CompilerParams(
            dimension_semantics=("parallel", "parallel"),
            vmem_limit_bytes=VMEM_LIMIT),
        cost_estimate=cost,
    )(a, w_t, residual)


# ----------------------- fused FFN (norm + 3 linears) ------------------------
def ffn_kernel(x_ref, nw_ref, w1_ref, w2_ref, w3_ref, o_ref, xn_sc, acc_sc):
    k = pl.program_id(1)
    nk = pl.num_programs(1)

    @pl.when(k == 0)
    def _init():
        x = x_ref[...].astype(jnp.float32)
        ms = jnp.mean(x * x, axis=-1, keepdims=True)
        xn = x * jax.lax.rsqrt(ms + EPS) * nw_ref[...].astype(jnp.float32)
        xn_sc[...] = xn.astype(jnp.bfloat16)
        acc_sc[...] = jnp.zeros_like(acc_sc)

    # h1 tile (TM, TK) is consumed immediately by the matching w2 slice; the
    # full (M, 4E) intermediate is never materialized and only one 4E-slice of
    # w1/w2 is resident per grid step.
    h1 = jnp.dot(xn_sc[...], w1_ref[...], preferred_element_type=jnp.float32)
    acc_sc[...] += jnp.dot(h1.astype(jnp.bfloat16), w2_ref[...],
                           preferred_element_type=jnp.float32)

    @pl.when(k == nk - 1)
    def _finalize():
        h3 = jnp.dot(acc_sc[...].astype(jnp.bfloat16), w3_ref[...],
                     preferred_element_type=jnp.float32)
        ff = h3 * jax.nn.sigmoid(h3)                            # SiLU
        o_ref[...] = (x_ref[...].astype(jnp.float32) + ff).astype(o_ref.dtype)


def ffn(x2d, norm_w, w1_t, w2_t, w3_t):
    M, E = x2d.shape
    Hd = w1_t.shape[1]                                          # 4E
    TM = _pick_tile(M, 256, 8)
    TK = _pick_tile(Hd, 512, 128)
    cost = pl.CostEstimate(
        flops=int(4 * M * E * Hd + 2 * M * E * E + 7 * M * E),
        transcendentals=int(M + M * E),
        bytes_accessed=int(2 * M * E * 4 + (2 * E * Hd + E * E) * 2))
    return pl.pallas_call(
        ffn_kernel,
        out_shape=jax.ShapeDtypeStruct((M, E), x2d.dtype),
        grid=(M // TM, Hd // TK),
        in_specs=[
            pl.BlockSpec((TM, E), lambda i, k: (i, 0)),   # residual stream
            pl.BlockSpec((1, E), lambda i, k: (0, 0)),    # norm2 weight
            pl.BlockSpec((E, TK), lambda i, k: (0, k)),   # w1 slice
            pl.BlockSpec((TK, E), lambda i, k: (k, 0)),   # w2 slice
            pl.BlockSpec((E, E), lambda i, k: (0, 0)),    # w3
        ],
        out_specs=pl.BlockSpec((TM, E), lambda i, k: (i, 0)),
        scratch_shapes=[
            pltpu.VMEM((TM, E), jnp.bfloat16),   # normed activations
            pltpu.VMEM((TM, E), jnp.float32),    # w2 accumulator
        ],
        compiler_params=pltpu.CompilerParams(
            dimension_semantics=("parallel", "arbitrary"),
            vmem_limit_bytes=VMEM_LIMIT),
        cost_estimate=cost,
    )(x2d, norm_w, w1_t, w2_t, w3_t)


# ----------------------------- vocab classifier ------------------------------
def classifier_kernel(x_ref, w_ref, o_ref):
    o_ref[...] = jnp.dot(x_ref[...].astype(jnp.bfloat16), w_ref[...],
                         preferred_element_type=jnp.float32).astype(o_ref.dtype)


def vocab_classifier(x2d, wcls_t):
    M, E = x2d.shape
    V = wcls_t.shape[1]
    TM = _pick_tile(M, 256, 8)
    TN = _pick_tile(V, 512, 128)
    cost = pl.CostEstimate(
        flops=int(2 * M * E * V), transcendentals=0,
        bytes_accessed=int(M * E * 4 + E * V * 2 + M * V * 4))
    return pl.pallas_call(
        classifier_kernel,
        out_shape=jax.ShapeDtypeStruct((M, V), jnp.float32),
        grid=(M // TM, V // TN),
        in_specs=[
            pl.BlockSpec((TM, E), lambda i, j: (i, 0)),
            pl.BlockSpec((E, TN), lambda i, j: (0, j)),
        ],
        out_specs=pl.BlockSpec((TM, TN), lambda i, j: (i, j)),
        compiler_params=pltpu.CompilerParams(
            dimension_semantics=("parallel", "parallel"),
            vmem_limit_bytes=VMEM_LIMIT),
        cost_estimate=cost,
    )(x2d, wcls_t)


# -------------------------------- layer glue ---------------------------------
def optimus_layer(x, lp, num_heads):
    B, S, E = x.shape
    D = E // num_heads
    M = B * S
    x2d = x.reshape(M, E)

    # norm1 + QKV projection; weight layout is [Q | K | V] with heads
    # contiguous inside each block so head slices are lane-aligned.
    qkv = norm_matmul(x2d, lp["norm1_w"], lp["wqkv_t"])          # (M, 3E) bf16
    q, k, v = jnp.split(qkv, 3, axis=-1)

    def heads(t):                                                # (M,E)->(B,H,S,D)
        return t.reshape(B, S, num_heads, D).transpose(0, 2, 1, 3)

    attn = flash_attention(heads(q), heads(k), heads(v))         # (B,H,S,D) bf16
    attn2d = attn.transpose(0, 2, 1, 3).reshape(M, E)

    x2d = matmul_residual(attn2d, lp["wout_t"], x2d)             # (M,E) f32
    x2d = ffn(x2d, lp["norm2_w"], lp["w1_t"], lp["w2_t"], lp["w3_t"])
    return x2d.reshape(B, S, E)


# ------------------------ parameter / PE construction -------------------------
def make_positional_encoding(maxlen, embed_size):
    position = jnp.arange(maxlen, dtype=jnp.float32)[:, None]
    div_term = jnp.exp(jnp.arange(0, embed_size, 2, dtype=jnp.float32)
                       * (-math.log(10000.0) / embed_size))
    pe = jnp.zeros((maxlen, embed_size), jnp.float32)
    pe = pe.at[:, 0::2].set(jnp.sin(position * div_term))
    pe = pe.at[:, 1::2].set(jnp.cos(position * div_term))
    return pe


def init_params(key, vocab_size, embed_size, nheads, nlayers, maxlen):
    initrange = 0.1
    E = embed_size

    def uni(k, shape, dtype=jnp.bfloat16):
        return jax.random.uniform(k, shape, jnp.float32,
                                  -initrange, initrange).astype(dtype)

    keys = jax.random.split(key, 2 + nlayers)
    params = {
        "embedding": uni(keys[0], (vocab_size, E), jnp.float32),
        "wcls_t": uni(keys[1], (E, vocab_size)),
        "pe": make_positional_encoding(maxlen, E),
        "layers": [],
    }
    for i in range(nlayers):
        lk = jax.random.split(keys[2 + i], 5)
        params["layers"].append({
            "wqkv_t": uni(lk[0], (E, 3 * E)),      # [Q | K | V], head-major
            "wout_t": uni(lk[1], (E, E)),
            "w1_t": uni(lk[2], (E, 4 * E)),
            "w2_t": uni(lk[3], (4 * E, E)),
            "w3_t": uni(lk[4], (E, E)),
            "norm1_w": jnp.ones((1, E), jnp.float32),
            "norm2_w": jnp.ones((1, E), jnp.float32),
        })
    return params


# ---------------------------------- forward -----------------------------------
def optimus_forward(tokens, params, num_heads):
    B, S = tokens.shape
    E = params["embedding"].shape[1]
    # embedding lookup + scale + positional encoding (plain-JAX gather glue)
    x = params["embedding"][tokens] * math.sqrt(E)               # (B, S, E) f32
    x = x + params["pe"][:S][None, :, :]
    for lp in params["layers"]:
        x = optimus_layer(x, lp, num_heads)
    logits = vocab_classifier(x.reshape(B * S, E), params["wcls_t"])
    return logits.reshape(B, S, -1)


if __name__ == "__main__":
    vocab_size, embed_size, nheads, nlayers, maxlen = 64, 32, 4, 2, 16
    batch, seq = 2, 8

    key = jax.random.PRNGKey(0)
    pkey, tkey = jax.random.split(key)
    params = init_params(pkey, vocab_size, embed_size, nheads, nlayers, maxlen)
    tokens = jax.random.randint(tkey, (batch, seq), 0, vocab_size, jnp.int32)

    logits = optimus_forward(tokens, params, nheads)
    jax.block_until_ready(logits)
    assert logits.shape == (batch, seq, vocab_size)
    assert bool(jnp.all(jnp.isfinite(logits)))
    print("KERNEL_OK")
</pallas_src>

<mosaic_0001>
module attributes {stable_mosaic.version = 11 : i64} {
  func.func @norm_matmul_kernel(%arg0: i32, %arg1: i32, %arg2: memref<16x32xf32, #tpu.memory_space<vmem>>, %arg3: memref<1x32xf32, #tpu.memory_space<vmem>>, %arg4: memref<32x96xbf16, #tpu.memory_space<vmem>>, %arg5: memref<16x96xbf16, #tpu.memory_space<vmem>>) attributes {dimension_semantics = [#tpu.dimension_semantics<parallel>, #tpu.dimension_semantics<parallel>], iteration_bounds = array<i64: 1, 1>, scalar_prefetch = 0 : i64, scratch_operands = 0 : i64, tpu.core_type = #tpu.core_type<tc>, window_params = [{transform_indices = @transform_0, window_bounds = array<i64: 16, 32>}, {pipeline_mode = #tpu.pipeline_mode<synchronous>, transform_indices = @transform_1, window_bounds = array<i64: 1, 32>}, {transform_indices = @transform_2, window_bounds = array<i64: 32, 96>}, {transform_indices = @transform_3, window_bounds = array<i64: 16, 96>}]} {
    %c0 = arith.constant 0 : index
    %c0_0 = arith.constant 0 : index
    %0 = vector.load %arg2[%c0, %c0_0] : memref<16x32xf32, #tpu.memory_space<vmem>>, vector<16x32xf32>
    %1 = arith.mulf %0, %0 : vector<16x32xf32>
    %cst = arith.constant dense<0.000000e+00> : vector<16xf32>
    %2 = vector.multi_reduction <add>, %1, %cst [1] : vector<16x32xf32> to vector<16xf32>
    %3 = vector.shape_cast %2 : vector<16xf32> to vector<16x1xf32>
    %cst_1 = arith.constant 3.200000e+01 : f32
    %4 = vector.broadcast %cst_1 : f32 to vector<16x1xf32>
    %5 = arith.divf %3, %4 : vector<16x1xf32>
    %cst_2 = arith.constant 9.99999974E-6 : f32
    %6 = vector.broadcast %cst_2 : f32 to vector<16x1xf32>
    %7 = arith.addf %5, %6 : vector<16x1xf32>
    %8 = math.rsqrt %7 : vector<16x1xf32>
    %9 = vector.broadcast %8 : vector<16x1xf32> to vector<16x32xf32>
    %10 = arith.mulf %0, %9 : vector<16x32xf32>
    %c0_3 = arith.constant 0 : index
    %c0_4 = arith.constant 0 : index
    %11 = vector.load %arg3[%c0_3, %c0_4] : memref<1x32xf32, #tpu.memory_space<vmem>>, vector<1x32xf32>
    %12 = vector.broadcast %11 : vector<1x32xf32> to vector<16x32xf32>
    %13 = arith.mulf %10, %12 : vector<16x32xf32>
    %14 = arith.truncf %13 : vector<16x32xf32> to vector<16x32xbf16>
    %c0_5 = arith.constant 0 : index
    %c0_6 = arith.constant 0 : index
    %15 = vector.load %arg4[%c0_5, %c0_6] : memref<32x96xbf16, #tpu.memory_space<vmem>>, vector<32x96xbf16>
    %cst_7 = arith.constant dense<0.000000e+00> : vector<16x96xf32>
    %16 = tpu.matmul %14, %15, %cst_7 {dimension_numbers = #tpu.dot_dimension_numbers<[1], [0], [0], [1], [0, 0, 1, 1], [], []>} : vector<16x32xbf16>, vector<32x96xbf16>, vector<16x96xf32> -> vector<16x96xf32>
    %17 = arith.truncf %16 : vector<16x96xf32> to vector<16x96xbf16>
    %c0_8 = arith.constant 0 : index
    %c0_9 = arith.constant 0 : index
    %18 = vector.load %arg5[%c0_8, %c0_9] : memref<16x96xbf16, #tpu.memory_space<vmem>>, vector<16x96xbf16>
    tpu.vector_store %arg5[%c0_8, %c0_9], %17 {strides = array<i32>} : memref<16x96xbf16, #tpu.memory_space<vmem>>, vector<16x96xbf16>,
    return
  }
  func.func @transform_0(%arg0: i32, %arg1: i32) -> (i32, i32) {
    %c0_i32 = arith.constant 0 : i32
    %c0_i32_0 = arith.constant 0 : i32
    return %arg0, %c0_i32 : i32, i32
  }
  func.func @transform_1(%arg0: i32, %arg1: i32) -> (i32, i32) {
    %c0_i32 = arith.constant 0 : i32
    %c0_i32_0 = arith.constant 0 : i32
    %c0_i32_1 = arith.constant 0 : i32
    return %c0_i32, %c0_i32_0 : i32, i32
  }
  func.func @transform_2(%arg0: i32, %arg1: i32) -> (i32, i32) {
    %c0_i32 = arith.constant 0 : i32
    %c0_i32_0 = arith.constant 0 : i32
    return %c0_i32, %arg1 : i32, i32
  }
  func.func @transform_3(%arg0: i32, %arg1: i32) -> (i32, i32) {
    %c0_i32 = arith.constant 0 : i32
    return %arg0, %arg1 : i32, i32
  }
}

</mosaic_0001>

<bundles_post_ra>
// kernel: tpu_custom_call.1
= control target key start
LH: loop header
LB: loop body
LE: loop exit
PB: predicated region body
PF: predicated region fallthrough
CT: control target
= control target key end

     0   :  { %8 = vsyncpa [#allocation3], 0  ;;  %s346_s0 = inlined_call_operand.hbm [shape: f32[16,32], index: 0, kind: input, shape index: {}]   ;;  %s347_s1 = inlined_call_operand.vmem [shape: f32[1,32], index: 1, kind: input, shape index: {}]   ;;  %s348_s2 = inlined_call_operand.hbm [shape: bf16[32,96], index: 2, kind: input, shape index: {}]   ;;  %s349_s3 = inlined_call_operand.hbm [shape: bf16[16,96], index: 3, kind: output, shape index: {}]  }
   0x1   :  { %9 = vsyncpa [#allocation6], 0 }
   0x2   :  { %10 = vsyncpa [#allocation4], 0  ;;  %s269_s12 = smov [#allocation2]   ;;  %s197_s16 = scalar_lea.hbm %s346_s0, 256 }
   0x3   :  { %s16_s13 = sshll.u32 %s269_s12, 4  ;;  %p198_p0 = scmp.ne.s32.totalorder %s346_s0, %s197_s16  ;;  %s17_s13 = int_to_ptr.vmem [resolvable:$true] %s16_s13 }
   0x4   :  { %p201_p1 = scmp.lt.u32.totalorder %s197_s16, %s346_s0 }
   0x6   :  { %p203_p2 = pnand %p201_p1, %p198_p0 }
   0x8   :  { %206 = shalt.err (!%p203_p2)
}
   0x9   :  { %s207_s21 = scalar_lea.vmem %s17_s13, 256  ;;  %p212_p4 = scmp.lt.s32.totalorder %s17_s13, %s17_s13 }
   0xa   :  { %p208_p3 = scmp.ne.s32.totalorder %s17_s13, %s207_s21  ;;  %p213_p5 = scmp.lt.s32.totalorder %s207_s21, %s207_s21 }
   0xc   :  { %p214_p6 = por %p213_p5, %p212_p4 }
   0xe   :  { %p215_p7 = pnand %p214_p6, %p208_p3 }
  0x10   :  { %218 = shalt.err (!%p215_p7)
}
  0x11   :  { %s270_s22 = smov 128   ;;  %s271_s23 = smov 8  }
  0x12   :  { %22 = dma.hbm_to_vmem [thread:$0]  %s346_s0, 256, %s17_s13, [#allocation3], %s270_s22, %s270_s22, %s271_s23  }
  0x13   :  { %s272_s26 = smov [#allocation5]   ;;  %s219_s30 = scalar_lea.hbm %s348_s2, 256 }
  0x14   :  { %s30_s27 = sshll.u32 %s272_s26, 4  ;;  %p220_p8 = scmp.ne.s32.totalorder %s348_s2, %s219_s30  ;;  %s31_s27 = int_to_ptr.vmem [resolvable:$true] %s30_s27 }
  0x15   :  { %p223_p9 = scmp.lt.u32.totalorder %s219_s30, %s348_s2 }
  0x17   :  { %p225_p10 = pnand %p223_p9, %p220_p8 }
  0x19   :  { %228 = shalt.err (!%p225_p10)
}
  0x1a   :  { %s229_s8 = scalar_lea.vmem %s31_s27, 256  ;;  %p234_p12 = scmp.lt.s32.totalorder %s31_s27, %s31_s27 }
  0x1b   :  { %p230_p11 = scmp.ne.s32.totalorder %s31_s27, %s229_s8  ;;  %p235_p13 = scmp.lt.s32.totalorder %s229_s8, %s229_s8 }
  0x1d   :  { %p236_p0 = por %p235_p13, %p234_p12 }
  0x1f   :  { %p237_p1 = pnand %p236_p0, %p230_p11 }
  0x21   :  { %240 = shalt.err (!%p237_p1)
}
  0x22   :  { %s273_s0 = smov 64   ;;  %s274_s9 = smov 4  }
  0x23   :  { %36 = dma.hbm_to_vmem [thread:$0]  %s348_s2, 256, %s31_s27, [#allocation6], %s273_s0, %s273_s0, %s274_s9  }
  0x24   :  { %263 = dma.done.wait [#allocation3], 256  }
  0x25   :  { %264 = vsyncadd [#allocation3], 4294967040 }
  0x26   :  { %265 = dma.done.wait [#allocation6], 256  }
  0x27   :  { %266 = vsyncadd [#allocation6], 4294967040  ;;  %v44_v0 = vld [vmem:[#allocation2] sm:$0xff]  ;;  %vm48_vm0 = vcmask 261120   ;;  %v45_v1 = vld [vmem:[#allocation2 + $0x8] sm:$0xff]  ;;  %v275_v7 = vmov 0.0  }
  0x28   :  { %v46_v2 = vmul.f32 %v44_v0, %v44_v0  ;;  %v47_v3 = vmul.f32 %v45_v1, %v45_v1  ;;  %v191_v6 = vld [vmem:[#allocation5] sm:$0xff]   ;;  %174 = vmatprep.subr.bf16.mxu0 %v275_v7  ;;  %vm276_vm1 = vmmov 0   ;;  %v192_v8 = vld [vmem:[#allocation5 + $0x8] sm:$0xff]   ;;  %v163_v18 = vld [vmem:[%s347_s1] ss:$0 sm:$0xff]  ;;  %vm142_vm2 = vcmask 781312  }
  0x29   :  { %178 = vmatprep.mubr.msk.bf16.mxu0 %vm276_vm1, %v275_v7  ;;  %175 = vmatpush3.bf16.msra.mxu0 %v191_v6  ;;  %s277_s13 = smov [#allocation7]  }
  0x2a   :  { %v49_v4 = vsel %vm48_vm0, %v46_v2, 0.0  ;;  %v52_v5 = vsel %vm48_vm0, %v47_v3, 0.0  ;;  %176 = vmatprep.subr.bf16.mxu0 %v275_v7  ;;  %s150_s14 = sshll.u32 %s277_s13, 4  ;;  %s151_s14 = int_to_ptr.vmem [resolvable:$true] %s150_s14 }
  0x2b   :  { %50 = vadd.xlane.f32.xlu0 %v49_v4  ;;  %s241_s15 = scalar_lea.vmem %s151_s14, 128  ;;  %p246_p3 = scmp.lt.s32.totalorder %s151_s14, %s151_s14 }
  0x2c   :  { %p242_p2 = scmp.ne.s32.totalorder %s151_s14, %s241_s15  ;;  %p247_p4 = scmp.lt.s32.totalorder %s241_s15, %s241_s15 }
  0x2d   :  { %177 = vmatpush3.bf16.msra.mxu0 %v192_v8 }
  0x2e   :  { %p248_p5 = por %p247_p4, %p246_p3 }
  0x2f   :  { %53 = vadd.xlane.f32.xlu0 %v52_v5 }
  0x30   :  { %p249_p6 = pnand %p248_p5, %p242_p2 }
  0xb8   :  { %v51_v9 = vpop.xlane.xlu0 %50 }
  0xb9   :  { %v56_v10 = vmul.f32 0.03125, %v51_v9 }
  0xbb   :  { %v58_v11 = vadd.f32 1e-05, %v56_v10 }
  0xbc   :  { %v54_v12 = vpop.xlane.xlu0 %53 }
  0xbd   :  { %193 = vrsqrt.f32 %v58_v11  ;;  %v57_v13 = vmul.f32 0.03125, %v54_v12 }
  0xbf   :  { %v59_v14 = vadd.f32 1e-05, %v57_v13 }
  0xc1   :  { %195 = vrsqrt.f32 %v59_v14 }
  0xc7   :  { %v194_v15 = vpop.eup %193 }
  0xc8   :  { %v62_v16 = vmul.f32 %v194_v15, %v44_v0 }
  0xca   :  { %v71_v20 = vmul.f32 %v163_v18, %v62_v16 }
  0xcb   :  { %v196_v17 = vpop.eup %195 }
  0xcc   :  { %v63_v19 = vmul.f32 %v196_v17, %v45_v1 }
  0xce   :  { %v72_v21 = vmul.f32 %v163_v18, %v63_v19 }
  0xd0   :  { %v73_v22 = vpack.c.bf16 %v72_v21, %v71_v20 }
  0xd2   :  { %179 = vmatmul.mubr.msk.bf16.vlgmr.msra.gmra.mrb[0].mxu0 %vm48_vm0, %v73_v22 }
 0x1a5   :  { %v127_v23 = vpop.f32.mrb[0].mxu0 }
 0x1a6   :  { %v169_v24 = vpack.c.bf16 %v127_v23, %v127_v23  ;;  %v180_v25 = vpop.f32.mrb[1].mxu0 }
 0x1a7   :  { %v130_v26 = vpop.f32.mrb[2].mxu0 }
 0x1a8   :  { %v170_v27 = vpack.c.bf16 %v130_v26, %v130_v26  ;;  %v181_v28 = vpop.f32.mrb[3].mxu0  ;;  %143 = vst.msk [vmem:[#allocation7] sm:$0xf] %vm142_vm2, %v169_v24 }
 0x1aa   :  { %144 = vst.msk [vmem:[#allocation7 + $0x4] sm:$0xf] %vm142_vm2, %v170_v27 }
 0x1ab   :  { %252 = shalt.err (!%p249_p6)
}
 0x1ac   :  { %s253_s17 = scalar_lea.hbm %s349_s3, 128 }
 0x1ad   :  { %p254_p7 = scmp.ne.s32.totalorder %s349_s3, %s253_s17  ;;  %p257_p8 = scmp.lt.u32.totalorder %s253_s17, %s349_s3 }
 0x1af   :  { %p259_p9 = pnand %p257_p8, %p254_p7 }
 0x1b1   :  { %262 = shalt.err (!%p259_p9)
}
 0x1b2   :  { %156 = dma.vmem_to_hbm [thread:$0]  %s151_s14, 128, %s349_s3, [#allocation4], %s273_s0, %s273_s0, %s274_s9  }
 0x1b3   :  { %267 = dma.done.wait [#allocation4], 128  }
 0x1b4   :  { %268 = vsyncadd [#allocation4], 4294967168 }
 0x1b5   :  { %160 = vsyncpa [#allocation3], 1 }
 0x1b6   :  { %161 = vsyncpa [#allocation6], 1 }
 0x1b7   :  { %162 = vsyncpa [#allocation4], 1 }

</bundles_post_ra>
